<compile_context>
chip_gen: v6e
topology: v6e:2x2x1
jax: 0.10.0
libtpu: 0.0.40
codegen_flags: <defaults>
</compile_context>

<pallas_src>
import functools
import math

import jax
import jax.numpy as jnp
from jax import lax
from jax.experimental import pallas as pl
from jax.experimental.pallas import tpu as pltpu

LN_EPS = 1e-5      # torch.nn.LayerNorm default eps
F_PAD = 128        # lane width every layer is padded to


def _round_up(x, m):
    return ((x + m - 1) // m) * m


def _choose_block_b(batch):
    """<=512 rows: one grid step; bigger: two 'parallel' steps (v7x 2nd TC), capped at 2048."""
    bb = _round_up(max(batch, 8), 8)
    if bb > 512:
        bb = _round_up((bb + 1) // 2, 8)
    return min(bb, 2048)


# ---------------- fused Pallas kernel ----------------

def _make_kernel(hidden_sizes, action_dim, mm_dtype):
    n_hidden = len(hidden_sizes)
    reduce_head = (action_dim == 1)

    def kernel(x_ref, w_ref, aux_ref, o_ref):
        x = x_ref[...].astype(jnp.float32)
        for i, h in enumerate(hidden_sizes):
            w = w_ref[i * 128:(i + 1) * 128, :]          # (128,128) mm_dtype, zero padded
            aux = aux_ref[i * 8:(i + 1) * 8, :]          # rows: [bias, gamma, beta, 0...]
            # Linear (MXU, f32 accumulation); padded lanes of y are exactly zero.
            y = jnp.dot(x.astype(mm_dtype), w, preferred_element_type=jnp.float32)
            y = y + aux[0:1, :]
            # LayerNorm: single-pass stats in f32 (padded-lane contributions are zero).
            inv_h = 1.0 / h
            s1 = jnp.sum(y, axis=-1, keepdims=True)
            s2 = jnp.sum(y * y, axis=-1, keepdims=True)
            mean = s1 * inv_h
            var = jnp.maximum(s2 * inv_h - mean * mean, 0.0)
            y = (y - mean) * lax.rsqrt(var + LN_EPS)
            y = y * aux[1:2, :] + aux[2:3, :]            # gamma/beta pads are zero -> lanes stay 0
            # ReLU
            x = jnp.maximum(y, 0.0)

        haux = aux_ref[n_hidden * 8:n_hidden * 8 + 8, :]
        if reduce_head:
            # action_dim == 1: VPU multiply + cross-lane (XLU) reduce, tiny masked store.
            wq = haux[0:1, :]                                    # (1, 128) f32, zero padded
            bq = haux[1:2, 0:1]                                  # (1, 1)
            q = jnp.sum(x * wq, axis=-1, keepdims=True) + bq     # (block_b, 1)
            o_ref[...] = q.astype(o_ref.dtype)
        else:
            wq = w_ref[n_hidden * 128:(n_hidden + 1) * 128, :]   # (128, 128) zero padded
            bq = haux[0:1, :]                                    # (1, 128) zero padded
            q = jnp.dot(x.astype(mm_dtype), wq, preferred_element_type=jnp.float32) + bq
            o_ref[...] = q[:, :action_dim].astype(o_ref.dtype)

    return kernel


# ---------------- wrapper (single fused pallas_call) ----------------

@functools.partial(jax.jit, static_argnames=("hidden_sizes", "action_dim"))
def critic_forward(obs, w_slab, aux_slab, *, hidden_sizes, action_dim):
    B, D = obs.shape
    assert D <= F_PAD and action_dim <= F_PAD and all(h <= F_PAD for h in hidden_sizes)

    block_b = _choose_block_b(B)
    b_pad = _round_up(B, block_b)
    obs_p = jnp.pad(obs, ((0, b_pad - B), (0, F_PAD - D)))       # lane-pad to 512 B rows

    kernel = _make_kernel(tuple(hidden_sizes), action_dim, w_slab.dtype)

    out = pl.pallas_call(
        kernel,
        out_shape=jax.ShapeDtypeStruct((b_pad, action_dim), jnp.float32),
        grid=(b_pad // block_b,),
        in_specs=[
            pl.BlockSpec((block_b, F_PAD), lambda i: (i, 0)),    # streamed batch tile
            pl.BlockSpec(w_slab.shape, lambda i: (0, 0)),        # VMEM-resident weight slab
            pl.BlockSpec(aux_slab.shape, lambda i: (0, 0)),      # VMEM-resident LN/head params
        ],
        out_specs=pl.BlockSpec((block_b, action_dim), lambda i: (i, 0)),
        compiler_params=pltpu.CompilerParams(dimension_semantics=("parallel",)),
    )(obs_p, w_slab, aux_slab)

    return out[:B]


# ---------------- parameter init (PyTorch-like uniform) + packing ----------------

def init_params(key, obs_dim, hidden_sizes, action_dim):
    hidden = []
    in_dim = obs_dim
    for h in hidden_sizes:
        key, kw, kb = jax.random.split(key, 3)
        bound = 1.0 / math.sqrt(in_dim)
        w = jax.random.uniform(kw, (in_dim, h), jnp.float32, -bound, bound)
        b = jax.random.uniform(kb, (h,), jnp.float32, -bound, bound)
        gamma = jnp.ones((h,), jnp.float32)      # nn.LayerNorm default weight
        beta = jnp.zeros((h,), jnp.float32)      # nn.LayerNorm default bias
        hidden.append((w, b, gamma, beta))
        in_dim = h
    key, kw, kb = jax.random.split(key, 3)
    bound = 1.0 / math.sqrt(in_dim)
    wq = jax.random.uniform(kw, (in_dim, action_dim), jnp.float32, -bound, bound)
    bq = jax.random.uniform(kb, (action_dim,), jnp.float32, -bound, bound)
    return {"hidden": hidden, "wq": wq, "bq": bq}


def pack_params(params, hidden_sizes, action_dim, mm_dtype=jnp.bfloat16):
    """Pack all parameters into a matmul-weight slab (mm_dtype) + an f32 aux slab."""
    n_hidden = len(hidden_sizes)
    w_rows = n_hidden * 128 + (0 if action_dim == 1 else 128)
    w_slab = jnp.zeros((w_rows, F_PAD), mm_dtype)
    aux = jnp.zeros((n_hidden * 8 + 8, F_PAD), jnp.float32)

    for i, (w, b, g, be) in enumerate(params["hidden"]):
        d, h = w.shape
        w_slab = w_slab.at[i * 128:i * 128 + d, :h].set(w.astype(mm_dtype))
        aux = aux.at[i * 8 + 0, :h].set(b)
        aux = aux.at[i * 8 + 1, :h].set(g)
        aux = aux.at[i * 8 + 2, :h].set(be)

    wq, bq = params["wq"], params["bq"]
    h_last = wq.shape[0]
    ho = n_hidden * 8
    if action_dim == 1:
        aux = aux.at[ho + 0, :h_last].set(wq[:, 0])      # q head stays f32 (VPU path)
        aux = aux.at[ho + 1, 0].set(bq[0])
    else:
        w_slab = w_slab.at[n_hidden * 128:n_hidden * 128 + h_last, :action_dim].set(
            wq.astype(mm_dtype))
        aux = aux.at[ho + 0, :action_dim].set(bq)
    return w_slab, aux


# ---------------- pure-JAX reference (matched matmul precision) ----------------

def critic_forward_ref(obs, params, action_dim, mm_dtype=jnp.bfloat16):
    x = obs
    for (w, b, g, be) in params["hidden"]:
        y = jnp.dot(x.astype(mm_dtype), w.astype(mm_dtype),
                    preferred_element_type=jnp.float32) + b
        mean = y.mean(-1, keepdims=True)
        var = ((y - mean) ** 2).mean(-1, keepdims=True)
        y = (y - mean) * lax.rsqrt(var + LN_EPS)
        x = jnp.maximum(y * g + be, 0.0)
    wq, bq = params["wq"], params["bq"]
    if action_dim == 1:
        return jnp.sum(x * wq[:, 0], axis=-1, keepdims=True) + bq[0]
    return jnp.dot(x.astype(mm_dtype), wq.astype(mm_dtype),
                   preferred_element_type=jnp.float32) + bq


if __name__ == "__main__":
    OBS_DIM = 24                 # concat of joint obs + joint act features
    HIDDEN = (32, 32)

    key = jax.random.PRNGKey(0)
    key, kp, kobs = jax.random.split(key, 3)
    params = init_params(kp, OBS_DIM, HIDDEN, 1)

    # --- scalar-Q critic (action_dim = 1), tiny batch, bf16 MXU path ---
    w_slab, aux_slab = pack_params(params, HIDDEN, 1, jnp.bfloat16)
    obs = jax.random.normal(kobs, (2, OBS_DIM), jnp.float32)
    q = jax.block_until_ready(
        critic_forward(obs, w_slab, aux_slab, hidden_sizes=HIDDEN, action_dim=1))
    q_ref = critic_forward_ref(obs, params, 1, jnp.bfloat16)
    assert q.shape == (2, 1)
    assert jnp.allclose(q, q_ref, atol=5e-3, rtol=5e-3), (q, q_ref)

    # --- larger batch exercising the 2-step "parallel" grid + batch padding ---
    key, kobs2 = jax.random.split(key)
    obs_big = jax.random.normal(kobs2, (640, OBS_DIM), jnp.float32)
    q_big = jax.block_until_ready(
        critic_forward(obs_big, w_slab, aux_slab, hidden_sizes=HIDDEN, action_dim=1))
    q_big_ref = critic_forward_ref(obs_big, params, 1, jnp.bfloat16)
    assert q_big.shape == (640, 1)
    assert jnp.allclose(q_big, q_big_ref, atol=5e-3, rtol=5e-3)

    # --- f32 weight-slab path: tight-tolerance verification of the same kernel ---
    w32, aux32 = pack_params(params, HIDDEN, 1, jnp.float32)
    q32 = jax.block_until_ready(
        critic_forward(obs_big, w32, aux32, hidden_sizes=HIDDEN, action_dim=1))
    q32_ref = critic_forward_ref(obs_big, params, 1, jnp.float32)
    assert jnp.allclose(q32, q32_ref, atol=1e-4, rtol=1e-4)

    # --- multi-output head (action_dim > 1): MXU head + action_dim-lane store ---
    key, kp3, kobs3 = jax.random.split(key, 3)
    params3 = init_params(kp3, OBS_DIM, HIDDEN, 3)
    w3, aux3 = pack_params(params3, HIDDEN, 3, jnp.bfloat16)
    obs3 = jax.random.normal(kobs3, (2, OBS_DIM), jnp.float32)
    q3 = jax.block_until_ready(
        critic_forward(obs3, w3, aux3, hidden_sizes=HIDDEN, action_dim=3))
    q3_ref = critic_forward_ref(obs3, params3, 3, jnp.bfloat16)
    assert q3.shape == (2, 3)
    assert jnp.allclose(q3, q3_ref, atol=5e-3, rtol=5e-3)

    print("KERNEL_OK")
</pallas_src>

<mosaic_0001>
module attributes {stable_mosaic.version = 11 : i64} {
  func.func @kernel(%arg0: i32, %arg1: memref<8x128xf32, #tpu.memory_space<vmem>>, %arg2: memref<256x128xbf16, #tpu.memory_space<vmem>>, %arg3: memref<24x128xf32, #tpu.memory_space<vmem>>, %arg4: memref<8x1xf32, #tpu.memory_space<vmem>>) attributes {dimension_semantics = [#tpu.dimension_semantics<parallel>], iteration_bounds = array<i64: 1>, scalar_prefetch = 0 : i64, scratch_operands = 0 : i64, tpu.core_type = #tpu.core_type<tc>, window_params = [{transform_indices = @transform_0, window_bounds = array<i64: 8, 128>}, {pipeline_mode = #tpu.pipeline_mode<synchronous>, transform_indices = @transform_1, window_bounds = array<i64: 256, 128>}, {pipeline_mode = #tpu.pipeline_mode<synchronous>, transform_indices = @transform_2, window_bounds = array<i64: 24, 128>}, {transform_indices = @transform_3, window_bounds = array<i64: 8, 1>}]} {
    %c0 = arith.constant 0 : index
    %c0_0 = arith.constant 0 : index
    %0 = vector.load %arg1[%c0, %c0_0] : memref<8x128xf32, #tpu.memory_space<vmem>>, vector<8x128xf32>
    %c0_1 = arith.constant 0 : index
    %c0_2 = arith.constant 0 : index
    %1 = vector.load %arg2[%c0_1, %c0_2] : memref<256x128xbf16, #tpu.memory_space<vmem>>, vector<128x128xbf16>
    %c0_3 = arith.constant 0 : index
    %c0_4 = arith.constant 0 : index
    %2 = vector.load %arg3[%c0_3, %c0_4] : memref<24x128xf32, #tpu.memory_space<vmem>>, vector<8x128xf32>
    %3 = arith.truncf %0 : vector<8x128xf32> to vector<8x128xbf16>
    %cst = arith.constant dense<0.000000e+00> : vector<8x128xf32>
    %4 = tpu.matmul %3, %1, %cst {dimension_numbers = #tpu.dot_dimension_numbers<[1], [0], [0], [1], [0, 0, 1, 1], [], []>} : vector<8x128xbf16>, vector<128x128xbf16>, vector<8x128xf32> -> vector<8x128xf32>
    %5 = vector.extract_strided_slice %2 {offsets = [0, 0], sizes = [1, 128], strides = [1, 1]} : vector<8x128xf32> to vector<1x128xf32>
    %6 = vector.broadcast %5 : vector<1x128xf32> to vector<8x128xf32>
    %7 = arith.addf %4, %6 : vector<8x128xf32>
    %cst_5 = arith.constant dense<0.000000e+00> : vector<8xf32>
    %8 = vector.multi_reduction <add>, %7, %cst_5 [1] : vector<8x128xf32> to vector<8xf32>
    %9 = vector.shape_cast %8 : vector<8xf32> to vector<8x1xf32>
    %10 = arith.mulf %7, %7 : vector<8x128xf32>
    %cst_6 = arith.constant dense<0.000000e+00> : vector<8xf32>
    %11 = vector.multi_reduction <add>, %10, %cst_6 [1] : vector<8x128xf32> to vector<8xf32>
    %12 = vector.shape_cast %11 : vector<8xf32> to vector<8x1xf32>
    %cst_7 = arith.constant 3.125000e-02 : f32
    %13 = vector.broadcast %cst_7 : f32 to vector<8x1xf32>
    %14 = arith.mulf %9, %13 : vector<8x1xf32>
    %cst_8 = arith.constant 3.125000e-02 : f32
    %15 = vector.broadcast %cst_8 : f32 to vector<8x1xf32>
    %16 = arith.mulf %12, %15 : vector<8x1xf32>
    %17 = arith.mulf %14, %14 : vector<8x1xf32>
    %18 = arith.subf %16, %17 : vector<8x1xf32>
    %cst_9 = arith.constant 0.000000e+00 : f32
    %19 = vector.broadcast %cst_9 : f32 to vector<8x1xf32>
    %20 = arith.maximumf %18, %19 : vector<8x1xf32>
    %21 = vector.broadcast %14 : vector<8x1xf32> to vector<8x128xf32>
    %22 = arith.subf %7, %21 : vector<8x128xf32>
    %cst_10 = arith.constant 9.99999974E-6 : f32
    %23 = vector.broadcast %cst_10 : f32 to vector<8x1xf32>
    %24 = arith.addf %20, %23 : vector<8x1xf32>
    %25 = math.rsqrt %24 : vector<8x1xf32>
    %26 = vector.broadcast %25 : vector<8x1xf32> to vector<8x128xf32>
    %27 = arith.mulf %22, %26 : vector<8x128xf32>
    %28 = vector.extract_strided_slice %2 {offsets = [1, 0], sizes = [1, 128], strides = [1, 1]} : vector<8x128xf32> to vector<1x128xf32>
    %29 = vector.broadcast %28 : vector<1x128xf32> to vector<8x128xf32>
    %30 = arith.mulf %27, %29 : vector<8x128xf32>
    %31 = vector.extract_strided_slice %2 {offsets = [2, 0], sizes = [1, 128], strides = [1, 1]} : vector<8x128xf32> to vector<1x128xf32>
    %32 = vector.broadcast %31 : vector<1x128xf32> to vector<8x128xf32>
    %33 = arith.addf %30, %32 : vector<8x128xf32>
    %cst_11 = arith.constant 0.000000e+00 : f32
    %34 = vector.broadcast %cst_11 : f32 to vector<8x128xf32>
    %35 = arith.maximumf %33, %34 : vector<8x128xf32>
    %c128 = arith.constant 128 : index
    %c0_12 = arith.constant 0 : index
    %36 = vector.load %arg2[%c128, %c0_12] : memref<256x128xbf16, #tpu.memory_space<vmem>>, vector<128x128xbf16>
    %c8 = arith.constant 8 : index
    %c0_13 = arith.constant 0 : index
    %37 = vector.load %arg3[%c8, %c0_13] : memref<24x128xf32, #tpu.memory_space<vmem>>, vector<8x128xf32>
    %38 = arith.truncf %35 : vector<8x128xf32> to vector<8x128xbf16>
    %cst_14 = arith.constant dense<0.000000e+00> : vector<8x128xf32>
    %39 = tpu.matmul %38, %36, %cst_14 {dimension_numbers = #tpu.dot_dimension_numbers<[1], [0], [0], [1], [0, 0, 1, 1], [], []>} : vector<8x128xbf16>, vector<128x128xbf16>, vector<8x128xf32> -> vector<8x128xf32>
    %40 = vector.extract_strided_slice %37 {offsets = [0, 0], sizes = [1, 128], strides = [1, 1]} : vector<8x128xf32> to vector<1x128xf32>
    %41 = vector.broadcast %40 : vector<1x128xf32> to vector<8x128xf32>
    %42 = arith.addf %39, %41 : vector<8x128xf32>
    %cst_15 = arith.constant dense<0.000000e+00> : vector<8xf32>
    %43 = vector.multi_reduction <add>, %42, %cst_15 [1] : vector<8x128xf32> to vector<8xf32>
    %44 = vector.shape_cast %43 : vector<8xf32> to vector<8x1xf32>
    %45 = arith.mulf %42, %42 : vector<8x128xf32>
    %cst_16 = arith.constant dense<0.000000e+00> : vector<8xf32>
    %46 = vector.multi_reduction <add>, %45, %cst_16 [1] : vector<8x128xf32> to vector<8xf32>
    %47 = vector.shape_cast %46 : vector<8xf32> to vector<8x1xf32>
    %cst_17 = arith.constant 3.125000e-02 : f32
    %48 = vector.broadcast %cst_17 : f32 to vector<8x1xf32>
    %49 = arith.mulf %44, %48 : vector<8x1xf32>
    %cst_18 = arith.constant 3.125000e-02 : f32
    %50 = vector.broadcast %cst_18 : f32 to vector<8x1xf32>
    %51 = arith.mulf %47, %50 : vector<8x1xf32>
    %52 = arith.mulf %49, %49 : vector<8x1xf32>
    %53 = arith.subf %51, %52 : vector<8x1xf32>
    %cst_19 = arith.constant 0.000000e+00 : f32
    %54 = vector.broadcast %cst_19 : f32 to vector<8x1xf32>
    %55 = arith.maximumf %53, %54 : vector<8x1xf32>
    %56 = vector.broadcast %49 : vector<8x1xf32> to vector<8x128xf32>
    %57 = arith.subf %42, %56 : vector<8x128xf32>
    %cst_20 = arith.constant 9.99999974E-6 : f32
    %58 = vector.broadcast %cst_20 : f32 to vector<8x1xf32>
    %59 = arith.addf %55, %58 : vector<8x1xf32>
    %60 = math.rsqrt %59 : vector<8x1xf32>
    %61 = vector.broadcast %60 : vector<8x1xf32> to vector<8x128xf32>
    %62 = arith.mulf %57, %61 : vector<8x128xf32>
    %63 = vector.extract_strided_slice %37 {offsets = [1, 0], sizes = [1, 128], strides = [1, 1]} : vector<8x128xf32> to vector<1x128xf32>
    %64 = vector.broadcast %63 : vector<1x128xf32> to vector<8x128xf32>
    %65 = arith.mulf %62, %64 : vector<8x128xf32>
    %66 = vector.extract_strided_slice %37 {offsets = [2, 0], sizes = [1, 128], strides = [1, 1]} : vector<8x128xf32> to vector<1x128xf32>
    %67 = vector.broadcast %66 : vector<1x128xf32> to vector<8x128xf32>
    %68 = arith.addf %65, %67 : vector<8x128xf32>
    %cst_21 = arith.constant 0.000000e+00 : f32
    %69 = vector.broadcast %cst_21 : f32 to vector<8x128xf32>
    %70 = arith.maximumf %68, %69 : vector<8x128xf32>
    %c16 = arith.constant 16 : index
    %c0_22 = arith.constant 0 : index
    %71 = vector.load %arg3[%c16, %c0_22] : memref<24x128xf32, #tpu.memory_space<vmem>>, vector<8x128xf32>
    %72 = vector.extract_strided_slice %71 {offsets = [0, 0], sizes = [1, 128], strides = [1, 1]} : vector<8x128xf32> to vector<1x128xf32>
    %73 = vector.extract_strided_slice %71 {offsets = [1, 0], sizes = [1, 1], strides = [1, 1]} : vector<8x128xf32> to vector<1x1xf32>
    %74 = vector.broadcast %72 : vector<1x128xf32> to vector<8x128xf32>
    %75 = arith.mulf %70, %74 : vector<8x128xf32>
    %cst_23 = arith.constant dense<0.000000e+00> : vector<8xf32>
    %76 = vector.multi_reduction <add>, %75, %cst_23 [1] : vector<8x128xf32> to vector<8xf32>
    %77 = vector.shape_cast %76 : vector<8xf32> to vector<8x1xf32>
    %78 = vector.broadcast %73 : vector<1x1xf32> to vector<8x1xf32>
    %79 = arith.addf %77, %78 : vector<8x1xf32>
    %c0_24 = arith.constant 0 : index
    %c0_25 = arith.constant 0 : index
    %80 = vector.load %arg4[%c0_24, %c0_25] : memref<8x1xf32, #tpu.memory_space<vmem>>, vector<8x1xf32>
    tpu.vector_store %arg4[%c0_24, %c0_25], %79 {strides = array<i32>} : memref<8x1xf32, #tpu.memory_space<vmem>>, vector<8x1xf32>,
    return
  }
  func.func @transform_0(%arg0: i32) -> (i32, i32) {
    %c0_i32 = arith.constant 0 : i32
    %c0_i32_0 = arith.constant 0 : i32
    return %arg0, %c0_i32 : i32, i32
  }
  func.func @transform_1(%arg0: i32) -> (i32, i32) {
    %c0_i32 = arith.constant 0 : i32
    %c0_i32_0 = arith.constant 0 : i32
    %c0_i32_1 = arith.constant 0 : i32
    return %c0_i32, %c0_i32_0 : i32, i32
  }
  func.func @transform_2(%arg0: i32) -> (i32, i32) {
    %c0_i32 = arith.constant 0 : i32
    %c0_i32_0 = arith.constant 0 : i32
    %c0_i32_1 = arith.constant 0 : i32
    return %c0_i32, %c0_i32_0 : i32, i32
  }
  func.func @transform_3(%arg0: i32) -> (i32, i32) {
    %c0_i32 = arith.constant 0 : i32
    %c0_i32_0 = arith.constant 0 : i32
    return %arg0, %c0_i32 : i32, i32
  }
}

</mosaic_0001>

<bundles_post_ra>
// kernel: critic_forward.1
= control target key start
LH: loop header
LB: loop body
LE: loop exit
PB: predicated region body
PF: predicated region fallthrough
CT: control target
= control target key end

     0   :  { %8 = vsyncpa [#allocation3], 0  ;;  %s549_s0 = inlined_call_operand.vmem [shape: f32[8,128], index: 0, kind: input, shape index: {}]   ;;  %s550_s1 = inlined_call_operand.hbm [shape: bf16[256,128], index: 1, kind: input, shape index: {}]   ;;  %s551_s2 = inlined_call_operand.hbm [shape: f32[24,128], index: 2, kind: input, shape index: {}]   ;;  %s552_s3 = inlined_call_operand.vmem [shape: f32[8,1], index: 3, kind: output, shape index: {}]  }
   0x1   :  { %9 = vsyncpa [#allocation5], 0  ;;  %s481_s12 = smov [#allocation2]  }
   0x2   :  { %s17_s13 = sshll.u32 %s481_s12, 4  ;;  %s18_s13 = int_to_ptr.vmem [resolvable:$true] %s17_s13 }
   0x3   :  { %s445_s14 = scalar_lea.vmem %s18_s13, 2048  ;;  %p450_p1 = scmp.lt.s32.totalorder %s18_s13, %s18_s13 }
   0x4   :  { %p446_p0 = scmp.ne.s32.totalorder %s18_s13, %s445_s14  ;;  %p451_p2 = scmp.lt.s32.totalorder %s445_s14, %s445_s14 }
   0x6   :  { %p452_p3 = por %p451_p2, %p450_p1 }
   0x8   :  { %p453_p4 = pnand %p452_p3, %p446_p0 }
   0xa   :  { %456 = shalt.err (!%p453_p4)
}
   0xb   :  { %s482_s15 = smov 64   ;;  %s483_s16 = smov 4  }
   0xc   :  { %23 = dma.hbm_to_vmem [thread:$0]  %s550_s1, 2048, %s18_s13, [#allocation3], %s482_s15, %s482_s15, %s483_s16  }
   0xd   :  { %s484_s19 = smov [#allocation4]  }
   0xe   :  { %s29_s20 = sshll.u32 %s484_s19, 4  ;;  %s30_s20 = int_to_ptr.vmem [resolvable:$true] %s29_s20 }
   0xf   :  { %s465_s21 = scalar_lea.vmem %s30_s20, 384  ;;  %p470_p6 = scmp.lt.s32.totalorder %s30_s20, %s30_s20 }
  0x10   :  { %p466_p5 = scmp.ne.s32.totalorder %s30_s20, %s465_s21  ;;  %p471_p7 = scmp.lt.s32.totalorder %s465_s21, %s465_s21 }
  0x12   :  { %p472_p8 = por %p471_p7, %p470_p6 }
  0x14   :  { %p473_p9 = pnand %p472_p8, %p466_p5 }
  0x16   :  { %476 = shalt.err (!%p473_p9)
}
  0x17   :  { %s485_s22 = smov 128   ;;  %s486_s23 = smov 8  }
  0x18   :  { %35 = dma.hbm_to_vmem [thread:$0]  %s551_s2, 384, %s30_s20, [#allocation5], %s485_s22, %s485_s22, %s486_s23  }
  0x19   :  { %477 = dma.done.wait [#allocation3], 2048  }
  0x1a   :  { %478 = vsyncadd [#allocation3], 4294965248 }
  0x1b   :  { %479 = dma.done.wait [#allocation5], 384  }
  0x1c   :  { %480 = vsyncadd [#allocation5], 4294966912  ;;  %v487_v0 = vmov 0.0   ;;  %vm488_vm0 = vmmov 0   ;;  %v417_v1 = vld [vmem:[#allocation2 + $0x38] sm:$0xff]   ;;  %v418_v2 = vld [vmem:[#allocation2 + $0x30] sm:$0xff]   ;;  %v62_v11 = vlaneseq }
  0x1d   :  { %369 = vmatprep.subr.bf16.mxu0 %v487_v0  ;;  %385 = vmatprep.mubr.msk.bf16.mxu0 %vm488_vm0, %v487_v0  ;;  %v419_v3 = vld [vmem:[#allocation2 + $0x28] sm:$0xff]   ;;  %v420_v4 = vld [vmem:[#allocation2 + $0x20] sm:$0xff]   ;;  %v421_v5 = vld [vmem:[#allocation2 + $0x18] sm:$0xff]   ;;  %vm327_vm1 = vcmask 7168  }
  0x1e   :  { %389 = vmatprep.subr.bf16.mxu1 %v487_v0  ;;  %405 = vmatprep.mubr.msk.bf16.mxu1 %vm488_vm0, %v487_v0  ;;  %v422_v6 = vld [vmem:[#allocation2 + $0x10] sm:$0xff]   ;;  %v423_v7 = vld [vmem:[#allocation2 + $0x8] sm:$0xff]   ;;  %v424_v8 = vld [vmem:[#allocation2] sm:$0xff]   ;;  %v529_v12 = vshrl.u32 %v62_v11, 7 }
  0x1f   :  { %370 = vmatpush3.bf16.msra.mxu0 %v417_v1  ;;  %v43_v9 = vld [vmem:[%s549_s0] sm:$0xff]  ;;  %v425_v22 = vld [vmem:[#allocation2 + $0x78] sm:$0xff]   ;;  %v426_v23 = vld [vmem:[#allocation2 + $0x70] sm:$0xff]  }
  0x20   :  { %371 = vmatprep.subr.bf16.mxu0 %v487_v0  ;;  %v61_v10 = vpack.c.bf16 %v43_v9, %v43_v9  ;;  %v532_v13 = vsub.s32 0, %v529_v12  ;;  %v60_v14 = vld [vmem:[#allocation4] sm:$0xff]  ;;  %390 = vmatpush3.bf16.msra.mxu1 %v425_v22  ;;  %v427_v24 = vld [vmem:[#allocation2 + $0x68] sm:$0xff]   ;;  %v429_v26 = vld [vmem:[#allocation2 + $0x58] sm:$0xff]   ;;  %v170_v38 = vsub.s32 1, %v529_v12  ;;  %v175_v39 = vsub.s32 2, %v529_v12 }
  0x21   :  { %391 = vmatprep.subr.bf16.mxu1 %v487_v0  ;;  %v428_v25 = vld [vmem:[#allocation2 + $0x60] sm:$0xff]   ;;  %v430_v27 = vld [vmem:[#allocation2 + $0x50] sm:$0xff]   ;;  %v431_v28 = vld [vmem:[#allocation2 + $0x48] sm:$0xff]  }
  0x22   :  { %v65_v15 = vrot.slane %v60_v14, %v532_v13  ;;  %v432_v29 = vld [vmem:[#allocation2 + $0x40] sm:$0xff]   ;;  %v171_v40 = vrot.slane %v60_v14, %v170_v38  ;;  %v176_v44 = vrot.slane %v60_v14, %v175_v39  ;;  %v195_v49 = vld [vmem:[#allocation4 + $0x8] sm:$0xff] }
  0x23   :  { %372 = vmatpush3.bf16.msra.mxu0 %v418_v2  ;;  %v200_v50 = vrot.slane %v195_v49, %v532_v13  ;;  %v306_v1 = vrot.slane %v195_v49, %v170_v38 }
  0x24   :  { %373 = vmatprep.subr.bf16.mxu0 %v487_v0  ;;  %392 = vmatpush3.bf16.msra.mxu1 %v426_v23 }
  0x25   :  { %393 = vmatprep.subr.bf16.mxu1 %v487_v0 }
  0x27   :  { %374 = vmatpush3.bf16.msra.mxu0 %v419_v3 }
  0x28   :  { %375 = vmatprep.subr.bf16.mxu0 %v487_v0  ;;  %394 = vmatpush3.bf16.msra.mxu1 %v427_v24 }
  0x29   :  { %395 = vmatprep.subr.bf16.mxu1 %v487_v0 }
  0x2b   :  { %376 = vmatpush3.bf16.msra.mxu0 %v420_v4 }
  0x2c   :  { %377 = vmatprep.subr.bf16.mxu0 %v487_v0  ;;  %396 = vmatpush3.bf16.msra.mxu1 %v428_v25 }
  0x2d   :  { %397 = vmatprep.subr.bf16.mxu1 %v487_v0 }
  0x2f   :  { %378 = vmatpush3.bf16.msra.mxu0 %v421_v5  ;;  %v311_v5 = vrot.slane %v195_v49, %v175_v39 }
  0x30   :  { %379 = vmatprep.subr.bf16.mxu0 %v487_v0  ;;  %398 = vmatpush3.bf16.msra.mxu1 %v429_v26 }
  0x31   :  { %399 = vmatprep.subr.bf16.mxu1 %v487_v0 }
  0x33   :  { %380 = vmatpush3.bf16.msra.mxu0 %v422_v6  ;;  %v314_v6 = vld [vmem:[#allocation4 + $0x10] sm:$0xff] }
  0x34   :  { %381 = vmatprep.subr.bf16.mxu0 %v487_v0  ;;  %400 = vmatpush3.bf16.msra.mxu1 %v430_v27  ;;  %v318_v9 = vrot.slane %v314_v6, %v532_v13  ;;  %v325_v12 = vrot.slane %v314_v6, %v170_v38 }
  0x35   :  { %401 = vmatprep.subr.bf16.mxu1 %v487_v0 }
  0x37   :  { %382 = vmatpush3.bf16.msra.mxu0 %v423_v7 }
  0x38   :  { %383 = vmatprep.subr.bf16.mxu0 %v487_v0  ;;  %402 = vmatpush3.bf16.msra.mxu1 %v431_v28 }
  0x39   :  { %403 = vmatprep.subr.bf16.mxu1 %v487_v0 }
  0x3b   :  { %384 = vmatpush3.bf16.msra.mxu0 %v424_v8 }
  0x3c   :  { %404 = vmatpush3.bf16.msra.mxu1 %v432_v29 }
  0x3e   :  { %386 = vmatmul.mubr.bf16.vlgmr.msra.gmra.mxu0 %v61_v10 }
  0xfe   :  { %v148_v16 = vpop.f32.mrf.mxu0 }
  0xff   :  { %v149_v17 = vadd.f32 %v148_v16, %v65_v15 }
 0x100   :  { %v387_v18 = vpop.f32.mrf.mxu0 }
 0x101   :  { %154 = vadd.xlane.f32.xlu0 %v149_v17  ;;  %v156_v20 = vmul.f32 %v149_v17, %v149_v17 }
 0x102   :  { %v151_v19 = vpop.f32.mrf.mxu0 }
 0x104   :  { %v388_v21 = vpop.f32.mrf.mxu0 }
 0x105   :  { %157 = vadd.xlane.f32.xlu0 %v156_v20 }
 0x18a   :  { %v155_v30 = vpop.xlane.xlu0 %154 }
 0x18b   :  { %v159_v31 = vmul.f32 0.03125, %v155_v30 }
 0x18d   :  { %v161_v33 = vmul.f32 %v159_v31, %v159_v31  ;;  %v164_v41 = vsub.f32 %v149_v17, %v159_v31 }
 0x18e   :  { %v158_v32 = vpop.xlane.xlu0 %157 }
 0x18f   :  { %v160_v34 = vmul.f32 0.03125, %v158_v32 }
 0x191   :  { %v162_v35 = vsub.f32 %v160_v34, %v161_v33 }
 0x193   :  { %v163_v36 = vmax.f32 %v162_v35, 0.0 }
 0x195   :  { %v165_v37 = vadd.f32 1e-05, %v163_v36 }
 0x197   :  { %433 = vrsqrt.f32 %v165_v37 }
 0x1a4   :  { %v434_v42 = vpop.eup %433 }
 0x1a5   :  { %v167_v43 = vmul.f32 %v434_v42, %v164_v41 }
 0x1a7   :  { %v172_v45 = vmul.f32 %v171_v40, %v167_v43 }
 0x1a9   :  { %v177_v46 = vadd.f32 %v176_v44, %v172_v45 }
 0x1ab   :  { %v178_v47 = vmax.f32 %v177_v46, 0.0 }
 0x1ad   :  { %v196_v48 = vpack.c.bf16 %v178_v47, %v178_v47 }
 0x1af   :  { %406 = vmatmul.mubr.bf16.vlgmr.msra.gmra.mxu1 %v196_v48 }
 0x26f   :  { %v283_v51 = vpop.f32.mrf.mxu1 }
 0x270   :  { %v284_v52 = vadd.f32 %v283_v51, %v200_v50 }
 0x271   :  { %v407_v53 = vpop.f32.mrf.mxu1 }
 0x272   :  { %289 = vadd.xlane.f32.xlu1 %v284_v52  ;;  %v291_v55 = vmul.f32 %v284_v52, %v284_v52 }
 0x273   :  { %v286_v54 = vpop.f32.mrf.mxu1 }
 0x275   :  { %v408_v56 = vpop.f32.mrf.mxu1 }
 0x276   :  { %292 = vadd.xlane.f32.xlu1 %v291_v55 }
 0x2fb   :  { %v290_v57 = vpop.xlane.xlu1 %289 }
 0x2fc   :  { %v294_v58 = vmul.f32 0.03125, %v290_v57 }
 0x2fe   :  { %v296_v60 = vmul.f32 %v294_v58, %v294_v58  ;;  %v299_v2 = vsub.f32 %v284_v52, %v294_v58 }
 0x2ff   :  { %v293_v59 = vpop.xlane.xlu1 %292 }
 0x300   :  { %v295_v61 = vmul.f32 0.03125, %v293_v59 }
 0x302   :  { %v297_v62 = vsub.f32 %v295_v61, %v296_v60 }
 0x304   :  { %v298_v63 = vmax.f32 %v297_v62, 0.0 }
 0x306   :  { %v300_v0 = vadd.f32 1e-05, %v298_v63 }
 0x308   :  { %435 = vrsqrt.f32 %v300_v0 }
 0x315   :  { %v436_v3 = vpop.eup %435 }
 0x316   :  { %v302_v4 = vmul.f32 %v436_v3, %v299_v2 }
 0x318   :  { %v307_v7 = vmul.f32 %v306_v1, %v302_v4 }
 0x31a   :  { %v312_v8 = vadd.f32 %v311_v5, %v307_v7 }
 0x31c   :  { %v313_v10 = vmax.f32 %v312_v8, 0.0 }
 0x31e   :  { %v319_v11 = vmul.f32 %v318_v9, %v313_v10 }
 0x320   :  { %320 = vadd.xlane.f32.xlu0 %v319_v11 }
 0x3a9   :  { %v321_v14 = vpop.xlane.xlu0 %320 }
 0x3aa   :  { %v326_v15 = vadd.f32 %v325_v12, %v321_v14 }
 0x3ac   :  { %328 = vst.msk [vmem:[%s552_s3] sm:$0xff] %vm327_vm1, %v326_v15 }
 0x3ad   :  { %333 = vsyncpa [#allocation3], 1 }
 0x3ae   :  { %334 = vsyncpa [#allocation5], 1 }

</bundles_post_ra>
